<compile_context>
chip_gen: v5e
topology: v5e:2x2
jax: 0.10.0
libtpu: 0.0.40
codegen_flags: <defaults>
</compile_context>

<pallas_src>
import functools

import jax
import jax.numpy as jnp
from jax.experimental import pallas as pl
from jax.experimental.pallas import tpu as pltpu


def _round_up(x, m):
    return (x + m - 1) // m * m


# ---------------------------------------------------------------------------
# Kernel: 3-layer MLP  relu(x@W1+b1) -> relu(.@W2+b2) -> .@W3+b3 [-> tanh]
# ---------------------------------------------------------------------------
def _mlp_kernel(x_ref, w1_ref, b1_ref, w2_ref, b2_ref, w3_ref, b3_ref, o_ref,
                *, apply_tanh):
    x = x_ref[...]
    h = jnp.dot(x, w1_ref[...], preferred_element_type=jnp.float32)
    h = jnp.maximum(h + b1_ref[...], 0.0)
    h = jnp.dot(h, w2_ref[...], preferred_element_type=jnp.float32)
    h = jnp.maximum(h + b2_ref[...], 0.0)
    out = jnp.dot(h, w3_ref[...], preferred_element_type=jnp.float32)
    out = out + b3_ref[...]
    if apply_tanh:
        out = jnp.tanh(out)
    o_ref[...] = out.astype(o_ref.dtype)


def _mlp_pallas(x, w1, b1, w2, b2, w3, b3, *, apply_tanh, block_rows=256):
    """One pallas_call running the 3-layer MLP, tiled over the batch."""
    B, in_dim = x.shape
    h1, h2, out_dim = w1.shape[1], w2.shape[1], w3.shape[1]

    # Batch tile: multiple of 8 (f32 sublane); weights stay VMEM-resident.
    tm = min(block_rows, _round_up(B, 8))
    grid = (pl.cdiv(B, tm),)

    def resident(shape):
        return pl.BlockSpec(shape, lambda i: tuple(0 for _ in shape))

    flops = 2 * B * (in_dim * h1 + h1 * h2 + h2 * out_dim)
    bytes_accessed = (
        sum(int(a.size) * a.dtype.itemsize
            for a in (x, w1, b1, w2, b2, w3, b3))
        + B * out_dim * 4)
    transcendentals = B * out_dim if apply_tanh else 0

    return pl.pallas_call(
        functools.partial(_mlp_kernel, apply_tanh=apply_tanh),
        out_shape=jax.ShapeDtypeStruct((B, out_dim), jnp.float32),
        grid=grid,
        in_specs=[
            pl.BlockSpec((tm, in_dim), lambda i: (i, 0)),
            resident(w1.shape), resident(b1.shape),
            resident(w2.shape), resident(b2.shape),
            resident(w3.shape), resident(b3.shape),
        ],
        out_specs=pl.BlockSpec((tm, out_dim), lambda i: (i, 0)),
        compiler_params=pltpu.CompilerParams(
            dimension_semantics=("parallel",)),
        cost_estimate=pl.CostEstimate(
            flops=flops,
            transcendentals=transcendentals,
            bytes_accessed=bytes_accessed),
    )(x, w1, b1, w2, b2, w3, b3)


# ---------------------------------------------------------------------------
# BaseNet (the PyTorch spec): fc3(relu(fc2(relu(fc1(x)))))
# ---------------------------------------------------------------------------
def basenet_forward(x, params):
    return _mlp_pallas(x, *params, apply_tanh=False)


# ---------------------------------------------------------------------------
# DQN: tanh(cat(BaseNet_stock(xs), BaseNet_fin(xf))) as ONE fused kernel.
# ---------------------------------------------------------------------------
def pack_dqn_params(stock_params, finance_params):
    """Block-diagonally pack the two branch parameter sets (done once, offline)."""
    w1s, b1s, w2s, b2s, w3s, b3s = stock_params
    w1f, b1f, w2f, b2f, w3f, b3f = finance_params
    in_s, h1s = w1s.shape
    in_f, h1f = w1f.shape
    h2s, a_s = w2s.shape[1], w3s.shape[1]
    h2f, a_f = w2f.shape[1], w3f.shape[1]

    w1 = jnp.zeros((in_s + in_f, h1s + h1f), jnp.float32)
    w1 = w1.at[:in_s, :h1s].set(w1s).at[in_s:, h1s:].set(w1f)
    b1 = jnp.concatenate([b1s, b1f], axis=1)

    w2 = jnp.zeros((h1s + h1f, h2s + h2f), jnp.float32)
    w2 = w2.at[:h1s, :h2s].set(w2s).at[h1s:, h2s:].set(w2f)
    b2 = jnp.concatenate([b2s, b2f], axis=1)

    w3 = jnp.zeros((h2s + h2f, a_s + a_f), jnp.float32)
    w3 = w3.at[:h2s, :a_s].set(w3s).at[h2s:, a_s:].set(w3f)
    b3 = jnp.concatenate([b3s, b3f], axis=1)
    return (w1, b1, w2, b2, w3, b3)


def dqn_forward(stock_state, finance_state, packed_params):
    """Single pallas_call; output columns [:A] are the stock branch, [A:] finance."""
    x = jnp.concatenate([stock_state, finance_state], axis=1)
    return _mlp_pallas(x, *packed_params, apply_tanh=True)


# ---------------------------------------------------------------------------
# Init + pure-JAX references
# ---------------------------------------------------------------------------
def init_basenet_params(key, in_size, action_size, fc1_size=64, fc2_size=64):
    ks = jax.random.split(key, 6)

    def lin(kw, kb, fan_in, fan_out):
        bound = 1.0 / jnp.sqrt(fan_in)
        w = jax.random.uniform(kw, (fan_in, fan_out), jnp.float32, -bound, bound)
        b = jax.random.uniform(kb, (1, fan_out), jnp.float32, -bound, bound)
        return w, b

    w1, b1 = lin(ks[0], ks[1], in_size, fc1_size)
    w2, b2 = lin(ks[2], ks[3], fc1_size, fc2_size)
    w3, b3 = lin(ks[4], ks[5], fc2_size, action_size)
    return (w1, b1, w2, b2, w3, b3)


def _mlp_ref(x, w1, b1, w2, b2, w3, b3):
    h = jnp.maximum(x @ w1 + b1, 0.0)
    h = jnp.maximum(h @ w2 + b2, 0.0)
    return h @ w3 + b3


def basenet_forward_ref(x, params):
    return _mlp_ref(x, *params)


def dqn_forward_ref(stock_state, finance_state, stock_params, finance_params):
    o1 = _mlp_ref(stock_state, *stock_params)
    o2 = _mlp_ref(finance_state, *finance_params)
    return jnp.tanh(jnp.concatenate([o1, o2], axis=1))


if __name__ == "__main__":
    key = jax.random.PRNGKey(0)
    k_stock, k_fin, k_xs, k_xf = jax.random.split(key, 4)

    B = 8
    stock_size, finance_size, action_size = 16, 12, 4
    fc1_size = fc2_size = 64

    stock_params = init_basenet_params(k_stock, stock_size, action_size,
                                       fc1_size, fc2_size)
    finance_params = init_basenet_params(k_fin, finance_size, action_size,
                                         fc1_size, fc2_size)

    stock_state = jax.random.normal(k_xs, (B, stock_size), jnp.float32)
    finance_state = jax.random.normal(k_xf, (B, finance_size), jnp.float32)

    # --- single BaseNet (exact PyTorch spec: relu, relu, linear; no tanh) ---
    base_out = jax.block_until_ready(
        jax.jit(basenet_forward)(stock_state, stock_params))
    base_ref = basenet_forward_ref(stock_state, stock_params)
    assert base_out.shape == (B, action_size), base_out.shape
    assert jnp.allclose(base_out, base_ref, atol=1e-5, rtol=1e-5), \
        float(jnp.max(jnp.abs(base_out - base_ref)))

    # --- fused two-branch DQN (block-diagonal packed, one kernel launch) ---
    packed = pack_dqn_params(stock_params, finance_params)
    dqn_out = jax.block_until_ready(
        jax.jit(dqn_forward)(stock_state, finance_state, packed))
    dqn_ref = dqn_forward_ref(stock_state, finance_state, stock_params,
                              finance_params)
    assert dqn_out.shape == (B, 2 * action_size), dqn_out.shape
    assert jnp.allclose(dqn_out, dqn_ref, atol=1e-5, rtol=1e-5), \
        float(jnp.max(jnp.abs(dqn_out - dqn_ref)))

    print("KERNEL_OK")
</pallas_src>

<mosaic_0001>
module attributes {stable_mosaic.version = 11 : i64} {
  func.func @_mlp_kernel(%arg0: i32, %arg1: memref<8x16xf32, #tpu.memory_space<vmem>>, %arg2: memref<16x64xf32, #tpu.memory_space<vmem>>, %arg3: memref<1x64xf32, #tpu.memory_space<vmem>>, %arg4: memref<64x64xf32, #tpu.memory_space<vmem>>, %arg5: memref<1x64xf32, #tpu.memory_space<vmem>>, %arg6: memref<64x4xf32, #tpu.memory_space<vmem>>, %arg7: memref<1x4xf32, #tpu.memory_space<vmem>>, %arg8: memref<8x4xf32, #tpu.memory_space<vmem>>) attributes {dimension_semantics = [#tpu.dimension_semantics<parallel>], iteration_bounds = array<i64: 1>, scalar_prefetch = 0 : i64, scratch_operands = 0 : i64, tpu.core_type = #tpu.core_type<tc>, window_params = [{transform_indices = @transform_0, window_bounds = array<i64: 8, 16>}, {pipeline_mode = #tpu.pipeline_mode<synchronous>, transform_indices = @transform_1, window_bounds = array<i64: 16, 64>}, {pipeline_mode = #tpu.pipeline_mode<synchronous>, transform_indices = @transform_2, window_bounds = array<i64: 1, 64>}, {pipeline_mode = #tpu.pipeline_mode<synchronous>, transform_indices = @transform_3, window_bounds = array<i64: 64, 64>}, {pipeline_mode = #tpu.pipeline_mode<synchronous>, transform_indices = @transform_4, window_bounds = array<i64: 1, 64>}, {pipeline_mode = #tpu.pipeline_mode<synchronous>, transform_indices = @transform_5, window_bounds = array<i64: 64, 4>}, {pipeline_mode = #tpu.pipeline_mode<synchronous>, transform_indices = @transform_6, window_bounds = array<i64: 1, 4>}, {transform_indices = @transform_7, window_bounds = array<i64: 8, 4>}]} {
    %c0 = arith.constant 0 : index
    %c0_0 = arith.constant 0 : index
    %0 = vector.load %arg1[%c0, %c0_0] : memref<8x16xf32, #tpu.memory_space<vmem>>, vector<8x16xf32>
    %c0_1 = arith.constant 0 : index
    %c0_2 = arith.constant 0 : index
    %1 = vector.load %arg2[%c0_1, %c0_2] : memref<16x64xf32, #tpu.memory_space<vmem>>, vector<16x64xf32>
    %cst = arith.constant dense<0.000000e+00> : vector<8x64xf32>
    %2 = tpu.matmul %0, %1, %cst {dimension_numbers = #tpu.dot_dimension_numbers<[1], [0], [0], [1], [0, 0, 1, 1], [], []>} : vector<8x16xf32>, vector<16x64xf32>, vector<8x64xf32> -> vector<8x64xf32>
    %c0_3 = arith.constant 0 : index
    %c0_4 = arith.constant 0 : index
    %3 = vector.load %arg3[%c0_3, %c0_4] : memref<1x64xf32, #tpu.memory_space<vmem>>, vector<1x64xf32>
    %4 = vector.broadcast %3 : vector<1x64xf32> to vector<8x64xf32>
    %5 = arith.addf %2, %4 : vector<8x64xf32>
    %cst_5 = arith.constant 0.000000e+00 : f32
    %6 = vector.broadcast %cst_5 : f32 to vector<8x64xf32>
    %7 = arith.maximumf %5, %6 : vector<8x64xf32>
    %c0_6 = arith.constant 0 : index
    %c0_7 = arith.constant 0 : index
    %8 = vector.load %arg4[%c0_6, %c0_7] : memref<64x64xf32, #tpu.memory_space<vmem>>, vector<64x64xf32>
    %cst_8 = arith.constant dense<0.000000e+00> : vector<8x64xf32>
    %9 = tpu.matmul %7, %8, %cst_8 {dimension_numbers = #tpu.dot_dimension_numbers<[1], [0], [0], [1], [0, 0, 1, 1], [], []>} : vector<8x64xf32>, vector<64x64xf32>, vector<8x64xf32> -> vector<8x64xf32>
    %c0_9 = arith.constant 0 : index
    %c0_10 = arith.constant 0 : index
    %10 = vector.load %arg5[%c0_9, %c0_10] : memref<1x64xf32, #tpu.memory_space<vmem>>, vector<1x64xf32>
    %11 = vector.broadcast %10 : vector<1x64xf32> to vector<8x64xf32>
    %12 = arith.addf %9, %11 : vector<8x64xf32>
    %cst_11 = arith.constant 0.000000e+00 : f32
    %13 = vector.broadcast %cst_11 : f32 to vector<8x64xf32>
    %14 = arith.maximumf %12, %13 : vector<8x64xf32>
    %c0_12 = arith.constant 0 : index
    %c0_13 = arith.constant 0 : index
    %15 = vector.load %arg6[%c0_12, %c0_13] : memref<64x4xf32, #tpu.memory_space<vmem>>, vector<64x4xf32>
    %cst_14 = arith.constant dense<0.000000e+00> : vector<8x4xf32>
    %16 = tpu.matmul %14, %15, %cst_14 {dimension_numbers = #tpu.dot_dimension_numbers<[1], [0], [0], [1], [0, 0, 1, 1], [], []>} : vector<8x64xf32>, vector<64x4xf32>, vector<8x4xf32> -> vector<8x4xf32>
    %c0_15 = arith.constant 0 : index
    %c0_16 = arith.constant 0 : index
    %17 = vector.load %arg7[%c0_15, %c0_16] : memref<1x4xf32, #tpu.memory_space<vmem>>, vector<1x4xf32>
    %18 = vector.broadcast %17 : vector<1x4xf32> to vector<8x4xf32>
    %19 = arith.addf %16, %18 : vector<8x4xf32>
    %c0_17 = arith.constant 0 : index
    %c0_18 = arith.constant 0 : index
    %20 = vector.load %arg8[%c0_17, %c0_18] : memref<8x4xf32, #tpu.memory_space<vmem>>, vector<8x4xf32>
    tpu.vector_store %arg8[%c0_17, %c0_18], %19 {strides = array<i32>} : memref<8x4xf32, #tpu.memory_space<vmem>>, vector<8x4xf32>,
    return
  }
  func.func @transform_0(%arg0: i32) -> (i32, i32) {
    %c0_i32 = arith.constant 0 : i32
    %c0_i32_0 = arith.constant 0 : i32
    return %arg0, %c0_i32 : i32, i32
  }
  func.func @transform_1(%arg0: i32) -> (i32, i32) {
    %c0_i32 = arith.constant 0 : i32
    %c0_i32_0 = arith.constant 0 : i32
    %c0_i32_1 = arith.constant 0 : i32
    return %c0_i32, %c0_i32_0 : i32, i32
  }
  func.func @transform_2(%arg0: i32) -> (i32, i32) {
    %c0_i32 = arith.constant 0 : i32
    %c0_i32_0 = arith.constant 0 : i32
    %c0_i32_1 = arith.constant 0 : i32
    return %c0_i32, %c0_i32_0 : i32, i32
  }
  func.func @transform_3(%arg0: i32) -> (i32, i32) {
    %c0_i32 = arith.constant 0 : i32
    %c0_i32_0 = arith.constant 0 : i32
    %c0_i32_1 = arith.constant 0 : i32
    return %c0_i32, %c0_i32_0 : i32, i32
  }
  func.func @transform_4(%arg0: i32) -> (i32, i32) {
    %c0_i32 = arith.constant 0 : i32
    %c0_i32_0 = arith.constant 0 : i32
    %c0_i32_1 = arith.constant 0 : i32
    return %c0_i32, %c0_i32_0 : i32, i32
  }
  func.func @transform_5(%arg0: i32) -> (i32, i32) {
    %c0_i32 = arith.constant 0 : i32
    %c0_i32_0 = arith.constant 0 : i32
    %c0_i32_1 = arith.constant 0 : i32
    return %c0_i32, %c0_i32_0 : i32, i32
  }
  func.func @transform_6(%arg0: i32) -> (i32, i32) {
    %c0_i32 = arith.constant 0 : i32
    %c0_i32_0 = arith.constant 0 : i32
    %c0_i32_1 = arith.constant 0 : i32
    return %c0_i32, %c0_i32_0 : i32, i32
  }
  func.func @transform_7(%arg0: i32) -> (i32, i32) {
    %c0_i32 = arith.constant 0 : i32
    %c0_i32_0 = arith.constant 0 : i32
    return %arg0, %c0_i32 : i32, i32
  }
}

</mosaic_0001>

<bundles_post_ra>
// kernel: basenet_forward.1
= control target key start
LH: loop header
LB: loop body
LE: loop exit
PB: predicated region body
PF: predicated region fallthrough
CT: control target
= control target key end

     0   :  { %12 = vsyncpa [#allocation3], 0  ;;  %s340_s0 = inlined_call_operand.hbm [shape: f32[8,16], index: 0, kind: input, shape index: {}]   ;;  %s341_s1 = inlined_call_operand.hbm [shape: f32[16,64], index: 1, kind: input, shape index: {}]   ;;  %s342_s2 = inlined_call_operand.vmem [shape: f32[1,64], index: 2, kind: input, shape index: {}]   ;;  %s343_s3 = inlined_call_operand.vmem [shape: f32[64,64], index: 3, kind: input, shape index: {}]   ;;  %s344_s4 = inlined_call_operand.vmem [shape: f32[1,64], index: 4, kind: input, shape index: {}]   ;;  %s345_s5 = inlined_call_operand.vmem [shape: f32[64,4], index: 5, kind: input, shape index: {}]   ;;  %s346_s6 = inlined_call_operand.vmem [shape: f32[1,4], index: 6, kind: input, shape index: {}]   ;;  %s347_s7 = inlined_call_operand.vmem [shape: f32[8,4], index: 7, kind: output, shape index: {}]  }
   0x1   :  { %s19_s26 = sshll.u32 %s340_s0, 4  ;;  %s20_s26 = int_to_ptr.hbm [resolvable:$true] %s19_s26 }
   0x2   :  { %13 = vsyncpa [#allocation5], 0  ;;  %s230_s27 = smov [#allocation2]   ;;  %s29_s8 = sshll.u32 %s341_s1, 4  ;;  %s30_s8 = int_to_ptr.hbm [resolvable:$true] %s29_s8 }
   0x3   :  { %s21_s28 = sshll.u32 %s230_s27, 4  ;;  %s231_s9 = smov [#allocation4]   ;;  %s22_s28 = int_to_ptr.vmem [resolvable:$true] %s21_s28 }
   0x4   :  { %24 = dma.hbm_to_vmem [thread:$0]  %s20_s26, 128, %s22_s28, [#allocation3]  }
   0x5   :  { %s31_s10 = sshll.u32 %s231_s9, 4  ;;  %s232_s11 = smov 128   ;;  %s32_s10 = int_to_ptr.vmem [resolvable:$true] %s31_s10 }
   0x6   :  { %s233_s12 = smov 8  }
   0x7   :  { %37 = dma.hbm_to_vmem [thread:$0]  %s30_s8, 256, %s32_s10, [#allocation5], %s232_s11, %s232_s11, %s233_s12  }
   0x8   :  { %226 = dma.done.wait [#allocation3], 128  }
   0x9   :  { %227 = vsyncadd [#allocation3], 4294967168 }
   0xa   :  { %228 = dma.done.wait [#allocation5], 256  }
   0xb   :  { %229 = vsyncadd [#allocation5], 4294967040  ;;  %v58_v0 = vld [vmem:[#allocation4 + $0x8] sm:$0xff]  ;;  %v57_v1 = vld [vmem:[#allocation4] sm:$0xff]  ;;  %vm63_vm0 = vcmask 130048   ;;  %vm100_vm1 = vcmask 523264  }
   0xc   :  { %81 = vmatpush.msra.mxu0 %v58_v0  ;;  %v56_v2 = vld [vmem:[#allocation2] sm:$0xff]  ;;  %v95_v3 = vld [vmem:[%s343_s3 + $0x38] sm:$0xff]  ;;  %v94_v4 = vld [vmem:[%s343_s3 + $0x30] sm:$0xff]  ;;  %vm160_vm2 = vcmask 31744  }
   0xd   :  { %112 = vmatpush.msra.mxu1 %v95_v3  ;;  %v93_v5 = vld [vmem:[%s343_s3 + $0x28] sm:$0xff]  ;;  %v92_v6 = vld [vmem:[%s343_s3 + $0x20] sm:$0xff]  ;;  %v91_v7 = vld [vmem:[%s343_s3 + $0x18] sm:$0xff] }
   0xe   :  { %82 = vmatpush.msra.mxu0 %v57_v1  ;;  %v90_v8 = vld [vmem:[%s343_s3 + $0x10] sm:$0xff]  ;;  %v89_v9 = vld [vmem:[%s343_s3 + $0x8] sm:$0xff]  ;;  %v88_v10 = vld [vmem:[%s343_s3] sm:$0xff] }
   0xf   :  { %168 = vmatmul.msk.f32.vlgmr.msra.gmra.mxu0 %vm63_vm0, %v56_v2  ;;  %113 = vmatpush.msra.mxu1 %v94_v4  ;;  %v132_v11 = vld [vmem:[%s345_s5 + $0x38] sm:$0xff]  ;;  %v131_v12 = vld [vmem:[%s345_s5 + $0x30] sm:$0xff]  ;;  %v130_v13 = vld [vmem:[%s345_s5 + $0x28] sm:$0xff] }
  0x10   :  { %148 = vmatpush.msra.mxu2 %v132_v11  ;;  %v129_v14 = vld [vmem:[%s345_s5 + $0x20] sm:$0xff]  ;;  %v128_v15 = vld [vmem:[%s345_s5 + $0x18] sm:$0xff]  ;;  %v127_v20 = vld [vmem:[%s345_s5 + $0x10] sm:$0xff] }
  0x11   :  { %114 = vmatpush.msra.mxu1 %v93_v5  ;;  %v175_v16 = vld [vmem:[%s342_s2] ss:$0 sm:$0xff]  ;;  %v126_v21 = vld [vmem:[%s345_s5 + $0x8] sm:$0xff] }
  0x12   :  { %149 = vmatpush.msra.mxu2 %v131_v12  ;;  %v125_v22 = vld [vmem:[%s345_s5] sm:$0xff] }
  0x13   :  { %115 = vmatpush.msra.mxu1 %v92_v6  ;;  %v176_v23 = vld [vmem:[%s344_s4] ss:$0 sm:$0xff] }
  0x14   :  { %150 = vmatpush.msra.mxu2 %v130_v13  ;;  %v177_v27 = vld [vmem:[%s346_s6] ss:$0 sm:$0xff] }
  0x15   :  { %116 = vmatpush.msra.mxu1 %v91_v7 }
  0x16   :  { %151 = vmatpush.msra.mxu2 %v129_v14 }
  0x17   :  { %117 = vmatpush.msra.mxu1 %v90_v8 }
  0x18   :  { %152 = vmatpush.msra.mxu2 %v128_v15 }
  0x19   :  { %118 = vmatpush.msra.mxu1 %v89_v9 }
  0x1a   :  { %153 = vmatpush.msra.mxu2 %v127_v20 }
  0x1b   :  { %119 = vmatpush.msra.mxu1 %v88_v10 }
  0x1c   :  { %154 = vmatpush.msra.mxu2 %v126_v21 }
  0x1e   :  { %155 = vmatpush.msra.mxu2 %v125_v22 }
  0x8c   :  { %v84_v17 = vpop.f32.mrf.mxu0 }
  0x8d   :  { %v85_v18 = vadd.f32 %v175_v16, %v84_v17 }
  0x8f   :  { %v87_v19 = vmax.f32 %v85_v18, 0.0 }
  0x91   :  { %169 = vmatmul.msk.f32.vlgmr.msra.gmra.mxu1 %vm100_vm1, %v87_v19 }
 0x10e   :  { %v121_v24 = vpop.f32.mrf.mxu1 }
 0x10f   :  { %v122_v25 = vadd.f32 %v176_v23, %v121_v24 }
 0x111   :  { %v124_v26 = vmax.f32 %v122_v25, 0.0 }
 0x113   :  { %170 = vmatmul.msk.f32.vlgmr.msra.gmra.mxu2 %vm100_vm1, %v124_v26 }
 0x196   :  { %v157_v28 = vpop.f32.mrf.mxu2 }
 0x197   :  { %v158_v29 = vadd.f32 %v177_v27, %v157_v28 }
 0x199   :  { %161 = vst.msk [vmem:[%s347_s7] sm:$0xff] %vm160_vm2, %v158_v29 }
 0x19a   :  { %166 = vsyncpa [#allocation3], 1 }
 0x19b   :  { %167 = vsyncpa [#allocation5], 1 }

</bundles_post_ra>
